<compile_context>
chip_gen: v5e
topology: v5e:2x2
jax: 0.10.0
libtpu: 0.0.40
codegen_flags: <defaults>
</compile_context>

<pallas_src>
import functools
import math

import jax
import jax.numpy as jnp
from jax.experimental import pallas as pl
from jax.experimental.pallas import tpu as pltpu

LN_EPS = 1e-5                      # torch.nn.LayerNorm default
_SQRT_HALF = 1.0 / math.sqrt(2.0)
_VMEM_LIMIT = 48 * 1024 * 1024     # headroom under v7x's 64 MiB VMEM


def _row_cp():
    return pltpu.CompilerParams(dimension_semantics=("parallel",),
                                vmem_limit_bytes=_VMEM_LIMIT)


def _layernorm_f32(x, g, b):
    mean = jnp.mean(x, axis=-1, keepdims=True)
    xc = x - mean
    var = jnp.mean(xc * xc, axis=-1, keepdims=True)
    return xc * jax.lax.rsqrt(var + LN_EPS) * g + b


def _gelu_erf(x):
    # exact (erf) gelu, matching HF ACT2FN["gelu"]
    return 0.5 * x * (1.0 + jax.lax.erf(x * _SQRT_HALF))


# ----------------------------- Pallas kernels ------------------------------

def ln_qkv_kernel(x_ref, g_ref, b_ref, w_ref, wb_ref, o_ref):
    """LayerNorm(x) @ W_qkv + b_qkv  (q scale already folded into W/b)."""
    x = x_ref[...].astype(jnp.float32)
    y = _layernorm_f32(x, g_ref[...], b_ref[...])
    out = jnp.dot(y, w_ref[...], preferred_element_type=jnp.float32) + wb_ref[...]
    o_ref[...] = out.astype(o_ref.dtype)


def attn_kernel(q_ref, k_ref, v_ref, o_ref):
    """Causal attention for one (batch, head): blocks are (S, head_dim)."""
    q = q_ref[...].astype(jnp.float32)     # query already scaled (folded into weights)
    k = k_ref[...].astype(jnp.float32)
    v = v_ref[...].astype(jnp.float32)
    # contract on head_dim of both operands without materializing k.T
    s = jax.lax.dot_general(q, k, (((1,), (1,)), ((), ())),
                            preferred_element_type=jnp.float32)   # (S, S)
    S = s.shape[0]
    row = jax.lax.broadcasted_iota(jnp.int32, (S, S), 0)
    col = jax.lax.broadcasted_iota(jnp.int32, (S, S), 1)
    s = jnp.where(col <= row, s, jnp.finfo(jnp.float32).min)      # causal mask
    s_max = jnp.max(s, axis=-1, keepdims=True)
    p = jnp.exp(s - s_max)
    p = p * pl.reciprocal(jnp.sum(p, axis=-1, keepdims=True), approx=True)
    out = jnp.dot(p, v, preferred_element_type=jnp.float32)
    o_ref[...] = out.astype(o_ref.dtype)
    # TODO(synk): for long sequences this full (S,S) score tile should become a
    # flash-style KV-tiled loop (online softmax + causal block skipping).


def outproj_res_ln2_fc1_kernel(a_ref, ow_ref, ob_ref, r_ref, g_ref, b_ref,
                               w1_ref, b1_ref, h_ref, f_ref):
    """attn @ Wo + bo + residual -> h ; gelu(LN2(h) @ W1 + b1) -> f."""
    h = jnp.dot(a_ref[...].astype(jnp.float32), ow_ref[...],
                preferred_element_type=jnp.float32)
    h = h + ob_ref[...] + r_ref[...].astype(jnp.float32)
    h_ref[...] = h.astype(h_ref.dtype)
    y = _layernorm_f32(h, g_ref[...], b_ref[...])
    f = jnp.dot(y, w1_ref[...], preferred_element_type=jnp.float32) + b1_ref[...]
    f_ref[...] = _gelu_erf(f).astype(f_ref.dtype)


def fc2_residual_kernel(f_ref, w_ref, b_ref, r_ref, o_ref):
    y = jnp.dot(f_ref[...].astype(jnp.float32), w_ref[...],
                preferred_element_type=jnp.float32)
    y = y + b_ref[...] + r_ref[...].astype(jnp.float32)
    o_ref[...] = y.astype(o_ref.dtype)


# ------------------------------- wrappers -----------------------------------

def _pick_row_tile(n, target=512):
    """Largest row tile (multiple of 8, <= target) that divides n; else n."""
    if n <= target:
        return n
    for t in range(target, 7, -8):
        if n % t == 0:
            return t
    return n


def ln_qkv(x2d, g, b, wqkv, bqkv, *, row_tile):
    n, h = x2d.shape
    o3 = wqkv.shape[1]
    return pl.pallas_call(
        ln_qkv_kernel,
        out_shape=jax.ShapeDtypeStruct((n, o3), x2d.dtype),
        grid=(n // row_tile,),
        in_specs=[
            pl.BlockSpec((row_tile, h), lambda i: (i, 0)),
            pl.BlockSpec((1, h), lambda i: (0, 0)),
            pl.BlockSpec((1, h), lambda i: (0, 0)),
            pl.BlockSpec((h, o3), lambda i: (0, 0)),
            pl.BlockSpec((1, o3), lambda i: (0, 0)),
        ],
        out_specs=pl.BlockSpec((row_tile, o3), lambda i: (i, 0)),
        compiler_params=_row_cp(),
    )(x2d, g.reshape(1, h), b.reshape(1, h), wqkv, bqkv.reshape(1, o3))


def causal_attention_flat(qkv, *, batch, seq, num_heads, head_dim, hidden, out_dtype):
    """qkv is [B*S, 3H] (q | k | v). Output is [B*S, H] already in merged-head layout.

    Head slicing is done purely in the BlockSpec index_maps, so there are no
    XLA-level split/merge-head transposes.
    """
    n = batch * seq
    return pl.pallas_call(
        attn_kernel,
        out_shape=jax.ShapeDtypeStruct((n, hidden), out_dtype),
        grid=(batch, num_heads),
        in_specs=[
            pl.BlockSpec((seq, head_dim), lambda b, h: (b, h)),                  # q
            pl.BlockSpec((seq, head_dim), lambda b, h: (b, num_heads + h)),      # k
            pl.BlockSpec((seq, head_dim), lambda b, h: (b, 2 * num_heads + h)),  # v
        ],
        out_specs=pl.BlockSpec((seq, head_dim), lambda b, h: (b, h)),
        compiler_params=pltpu.CompilerParams(
            dimension_semantics=("parallel", "parallel"),
            vmem_limit_bytes=_VMEM_LIMIT),
    )(qkv, qkv, qkv)


def outproj_res_ln2_fc1(attn2d, ow, ob, resid, g, b, w1, b1, *, row_tile):
    n, h = attn2d.shape
    inter = w1.shape[1]
    return pl.pallas_call(
        outproj_res_ln2_fc1_kernel,
        out_shape=(jax.ShapeDtypeStruct((n, h), attn2d.dtype),
                   jax.ShapeDtypeStruct((n, inter), attn2d.dtype)),
        grid=(n // row_tile,),
        in_specs=[
            pl.BlockSpec((row_tile, h), lambda i: (i, 0)),
            pl.BlockSpec((h, h), lambda i: (0, 0)),
            pl.BlockSpec((1, h), lambda i: (0, 0)),
            pl.BlockSpec((row_tile, h), lambda i: (i, 0)),
            pl.BlockSpec((1, h), lambda i: (0, 0)),
            pl.BlockSpec((1, h), lambda i: (0, 0)),
            pl.BlockSpec((h, inter), lambda i: (0, 0)),
            pl.BlockSpec((1, inter), lambda i: (0, 0)),
        ],
        out_specs=(pl.BlockSpec((row_tile, h), lambda i: (i, 0)),
                   pl.BlockSpec((row_tile, inter), lambda i: (i, 0))),
        compiler_params=_row_cp(),
    )(attn2d, ow, ob.reshape(1, h), resid, g.reshape(1, h), b.reshape(1, h),
      w1, b1.reshape(1, inter))


def fc2_residual(f2d, w2, b2, resid, *, row_tile):
    n, inter = f2d.shape
    h = w2.shape[1]
    return pl.pallas_call(
        fc2_residual_kernel,
        out_shape=jax.ShapeDtypeStruct((n, h), f2d.dtype),
        grid=(n // row_tile,),
        in_specs=[
            pl.BlockSpec((row_tile, inter), lambda i: (i, 0)),
            pl.BlockSpec((inter, h), lambda i: (0, 0)),
            pl.BlockSpec((1, h), lambda i: (0, 0)),
            pl.BlockSpec((row_tile, h), lambda i: (i, 0)),
        ],
        out_specs=pl.BlockSpec((row_tile, h), lambda i: (i, 0)),
        compiler_params=_row_cp(),
    )(f2d, w2, b2.reshape(1, h), resid)


def prepare_params(params, num_heads):
    """One-time host-side prep: fold 1/sqrt(head_dim) into q weights and
    concatenate q/k/v into a single (H, 3H) projection."""
    H = params["q_w"].shape[0]
    head_dim = H // num_heads
    scale = 1.0 / math.sqrt(head_dim)
    fused = dict(params)
    fused["wqkv"] = jnp.concatenate(
        [params["q_w"] * scale, params["k_w"], params["v_w"]], axis=1)
    fused["bqkv"] = jnp.concatenate(
        [params["q_b"] * scale, params["k_b"], params["v_b"]], axis=0)
    return fused


def fsgpt_block_forward(x, fused_params, num_heads):
    """Forward pass of FSGPTBlock (use_cache=False, no attention_mask/head_mask)."""
    B, S, H = x.shape
    head_dim = H // num_heads
    assert head_dim * num_heads == H
    # TODO(synk): head_dim < 128 needs a head-packing / flash-style attention variant;
    # the flat-layout attention BlockSpec below requires a lane-aligned head_dim.
    assert head_dim % 128 == 0, "this kernel path requires head_dim % 128 == 0"
    assert S % 8 == 0, "sequence length must be a multiple of 8"

    n = B * S
    row_tile = _pick_row_tile(n)
    x2d = x.reshape(n, H)

    # LN1 + fused QKV projection (q already scaled)
    qkv = ln_qkv(x2d, fused_params["ln1_g"], fused_params["ln1_b"],
                 fused_params["wqkv"], fused_params["bqkv"], row_tile=row_tile)

    # causal self-attention, head split/merge folded into BlockSpecs
    attn = causal_attention_flat(qkv, batch=B, seq=S, num_heads=num_heads,
                                 head_dim=head_dim, hidden=H, out_dtype=x.dtype)

    # out_proj + residual + LN2 + fc1 + gelu (resid_dropout identity in eval)
    h2d, f2d = outproj_res_ln2_fc1(attn, fused_params["o_w"], fused_params["o_b"], x2d,
                                   fused_params["ln2_g"], fused_params["ln2_b"],
                                   fused_params["fc1_w"], fused_params["fc1_b"],
                                   row_tile=row_tile)

    # fc2 + second residual
    out = fc2_residual(f2d, fused_params["fc2_w"], fused_params["fc2_b"], h2d,
                       row_tile=row_tile)
    return out.reshape(B, S, H)


# ------------------------------ reference (pure JAX) ------------------------

def _ref_forward(x, params, num_heads):
    B, S, H = x.shape
    d = H // num_heads

    def ln(t, g, b):
        m = jnp.mean(t, -1, keepdims=True)
        v = jnp.mean((t - m) ** 2, -1, keepdims=True)
        return (t - m) / jnp.sqrt(v + LN_EPS) * g + b

    def lin(t, w, b):
        return jnp.dot(t, w, precision=jax.lax.Precision.HIGHEST) + b

    h = ln(x, params["ln1_g"], params["ln1_b"])
    q = lin(h, params["q_w"], params["q_b"]) / math.sqrt(d)
    k = lin(h, params["k_w"], params["k_b"])
    v = lin(h, params["v_w"], params["v_b"])
    sh = lambda t: t.reshape(B, S, num_heads, d).transpose(0, 2, 1, 3)
    q, k, v = sh(q), sh(k), sh(v)
    s = jnp.einsum("bhqd,bhkd->bhqk", q, k, precision=jax.lax.Precision.HIGHEST)
    mask = jnp.tril(jnp.ones((S, S), bool))
    s = jnp.where(mask, s, jnp.finfo(jnp.float32).min)
    p = jax.nn.softmax(s, -1)
    a = jnp.einsum("bhqk,bhkd->bhqd", p, v, precision=jax.lax.Precision.HIGHEST)
    a = a.transpose(0, 2, 1, 3).reshape(B, S, H)
    h = lin(a, params["o_w"], params["o_b"]) + x
    h2 = ln(h, params["ln2_g"], params["ln2_b"])
    f = lin(h2, params["fc1_w"], params["fc1_b"])
    f = 0.5 * f * (1.0 + jax.lax.erf(f / math.sqrt(2.0)))
    return lin(f, params["fc2_w"], params["fc2_b"]) + h


# --------------------------------- main --------------------------------------

if __name__ == "__main__":
    # Small config consistent with FSGPTConfig semantics (head_dim = 128)
    B, S, H, NUM_HEADS, INTER = 2, 16, 256, 2, 512

    key = jax.random.PRNGKey(0)
    keys = jax.random.split(key, 16)

    def w(k, shape, scale=0.02):
        return (scale * jax.random.normal(k, shape)).astype(jnp.float32)

    params = {
        "ln1_g": 1.0 + w(keys[0], (H,)), "ln1_b": w(keys[1], (H,)),
        "q_w": w(keys[2], (H, H)), "q_b": w(keys[3], (H,)),
        "k_w": w(keys[4], (H, H)), "k_b": w(keys[5], (H,)),
        "v_w": w(keys[6], (H, H)), "v_b": w(keys[7], (H,)),
        "o_w": w(keys[8], (H, H)), "o_b": w(keys[9], (H,)),
        "ln2_g": 1.0 + w(keys[10], (H,)), "ln2_b": w(keys[11], (H,)),
        "fc1_w": w(keys[12], (H, INTER)), "fc1_b": w(keys[13], (INTER,)),
        "fc2_w": w(keys[14], (INTER, H)), "fc2_b": w(keys[15], (H,)),
    }

    x = jax.random.normal(jax.random.PRNGKey(42), (B, S, H), dtype=jnp.float32)

    fused_params = prepare_params(params, NUM_HEADS)
    out = fsgpt_block_forward(x, fused_params, NUM_HEADS)
    out = jax.block_until_ready(out)

    ref = jax.block_until_ready(_ref_forward(x, params, NUM_HEADS))
    assert out.shape == (B, S, H)
    # loose tolerance: in-kernel f32 MXU matmuls + approx reciprocal vs HIGHEST-precision XLA
    assert jnp.max(jnp.abs(out - ref)) < 5e-2

    print("KERNEL_OK")
</pallas_src>

<mosaic_0001>
module attributes {stable_mosaic.version = 11 : i64} {
  func.func @ln_qkv_kernel(%arg0: i32, %arg1: memref<32x256xf32, #tpu.memory_space<vmem>>, %arg2: memref<1x256xf32, #tpu.memory_space<vmem>>, %arg3: memref<1x256xf32, #tpu.memory_space<vmem>>, %arg4: memref<256x768xf32, #tpu.memory_space<vmem>>, %arg5: memref<1x768xf32, #tpu.memory_space<vmem>>, %arg6: memref<32x768xf32, #tpu.memory_space<vmem>>) attributes {dimension_semantics = [#tpu.dimension_semantics<parallel>], iteration_bounds = array<i64: 1>, scalar_prefetch = 0 : i64, scratch_operands = 0 : i64, tpu.core_type = #tpu.core_type<tc>, window_params = [{transform_indices = @transform_0, window_bounds = array<i64: 32, 256>}, {pipeline_mode = #tpu.pipeline_mode<synchronous>, transform_indices = @transform_1, window_bounds = array<i64: 1, 256>}, {pipeline_mode = #tpu.pipeline_mode<synchronous>, transform_indices = @transform_2, window_bounds = array<i64: 1, 256>}, {pipeline_mode = #tpu.pipeline_mode<synchronous>, transform_indices = @transform_3, window_bounds = array<i64: 256, 768>}, {pipeline_mode = #tpu.pipeline_mode<synchronous>, transform_indices = @transform_4, window_bounds = array<i64: 1, 768>}, {transform_indices = @transform_5, window_bounds = array<i64: 32, 768>}]} {
    %c0 = arith.constant 0 : index
    %c0_0 = arith.constant 0 : index
    %0 = vector.load %arg1[%c0, %c0_0] : memref<32x256xf32, #tpu.memory_space<vmem>>, vector<32x256xf32>
    %c0_1 = arith.constant 0 : index
    %c0_2 = arith.constant 0 : index
    %1 = vector.load %arg2[%c0_1, %c0_2] : memref<1x256xf32, #tpu.memory_space<vmem>>, vector<1x256xf32>
    %c0_3 = arith.constant 0 : index
    %c0_4 = arith.constant 0 : index
    %2 = vector.load %arg3[%c0_3, %c0_4] : memref<1x256xf32, #tpu.memory_space<vmem>>, vector<1x256xf32>
    %cst = arith.constant dense<0.000000e+00> : vector<32xf32>
    %3 = vector.multi_reduction <add>, %0, %cst [1] : vector<32x256xf32> to vector<32xf32>
    %4 = vector.shape_cast %3 : vector<32xf32> to vector<32x1xf32>
    %cst_5 = arith.constant 2.560000e+02 : f32
    %5 = vector.broadcast %cst_5 : f32 to vector<32x1xf32>
    %6 = arith.divf %4, %5 : vector<32x1xf32>
    %7 = vector.broadcast %6 : vector<32x1xf32> to vector<32x256xf32>
    %8 = arith.subf %0, %7 : vector<32x256xf32>
    %9 = arith.mulf %8, %8 : vector<32x256xf32>
    %cst_6 = arith.constant dense<0.000000e+00> : vector<32xf32>
    %10 = vector.multi_reduction <add>, %9, %cst_6 [1] : vector<32x256xf32> to vector<32xf32>
    %11 = vector.shape_cast %10 : vector<32xf32> to vector<32x1xf32>
    %cst_7 = arith.constant 2.560000e+02 : f32
    %12 = vector.broadcast %cst_7 : f32 to vector<32x1xf32>
    %13 = arith.divf %11, %12 : vector<32x1xf32>
    %cst_8 = arith.constant 9.99999974E-6 : f32
    %14 = vector.broadcast %cst_8 : f32 to vector<32x1xf32>
    %15 = arith.addf %13, %14 : vector<32x1xf32>
    %16 = math.rsqrt %15 : vector<32x1xf32>
    %17 = vector.broadcast %16 : vector<32x1xf32> to vector<32x256xf32>
    %18 = arith.mulf %8, %17 : vector<32x256xf32>
    %19 = vector.broadcast %1 : vector<1x256xf32> to vector<32x256xf32>
    %20 = arith.mulf %18, %19 : vector<32x256xf32>
    %21 = vector.broadcast %2 : vector<1x256xf32> to vector<32x256xf32>
    %22 = arith.addf %20, %21 : vector<32x256xf32>
    %c0_9 = arith.constant 0 : index
    %c0_10 = arith.constant 0 : index
    %23 = vector.load %arg4[%c0_9, %c0_10] : memref<256x768xf32, #tpu.memory_space<vmem>>, vector<256x768xf32>
    %cst_11 = arith.constant dense<0.000000e+00> : vector<32x768xf32>
    %24 = tpu.matmul %22, %23, %cst_11 {dimension_numbers = #tpu.dot_dimension_numbers<[1], [0], [0], [1], [0, 0, 1, 1], [], []>} : vector<32x256xf32>, vector<256x768xf32>, vector<32x768xf32> -> vector<32x768xf32>
    %c0_12 = arith.constant 0 : index
    %c0_13 = arith.constant 0 : index
    %25 = vector.load %arg5[%c0_12, %c0_13] : memref<1x768xf32, #tpu.memory_space<vmem>>, vector<1x768xf32>
    %26 = vector.broadcast %25 : vector<1x768xf32> to vector<32x768xf32>
    %27 = arith.addf %24, %26 : vector<32x768xf32>
    %c0_14 = arith.constant 0 : index
    %c0_15 = arith.constant 0 : index
    %28 = vector.load %arg6[%c0_14, %c0_15] : memref<32x768xf32, #tpu.memory_space<vmem>>, vector<32x768xf32>
    tpu.vector_store %arg6[%c0_14, %c0_15], %27 {strides = array<i32>} : memref<32x768xf32, #tpu.memory_space<vmem>>, vector<32x768xf32>,
    return
  }
  func.func @transform_0(%arg0: i32) -> (i32, i32) {
    %c0_i32 = arith.constant 0 : i32
    %c0_i32_0 = arith.constant 0 : i32
    return %arg0, %c0_i32 : i32, i32
  }
  func.func @transform_1(%arg0: i32) -> (i32, i32) {
    %c0_i32 = arith.constant 0 : i32
    %c0_i32_0 = arith.constant 0 : i32
    %c0_i32_1 = arith.constant 0 : i32
    return %c0_i32, %c0_i32_0 : i32, i32
  }
  func.func @transform_2(%arg0: i32) -> (i32, i32) {
    %c0_i32 = arith.constant 0 : i32
    %c0_i32_0 = arith.constant 0 : i32
    %c0_i32_1 = arith.constant 0 : i32
    return %c0_i32, %c0_i32_0 : i32, i32
  }
  func.func @transform_3(%arg0: i32) -> (i32, i32) {
    %c0_i32 = arith.constant 0 : i32
    %c0_i32_0 = arith.constant 0 : i32
    %c0_i32_1 = arith.constant 0 : i32
    return %c0_i32, %c0_i32_0 : i32, i32
  }
  func.func @transform_4(%arg0: i32) -> (i32, i32) {
    %c0_i32 = arith.constant 0 : i32
    %c0_i32_0 = arith.constant 0 : i32
    %c0_i32_1 = arith.constant 0 : i32
    return %c0_i32, %c0_i32_0 : i32, i32
  }
  func.func @transform_5(%arg0: i32) -> (i32, i32) {
    %c0_i32 = arith.constant 0 : i32
    %c0_i32_0 = arith.constant 0 : i32
    return %arg0, %c0_i32 : i32, i32
  }
}

</mosaic_0001>

<bundles_post_ra>
// kernel: tpu_custom_call.1
= control target key start
LH: loop header
LB: loop body
LE: loop exit
PB: predicated region body
PF: predicated region fallthrough
CT: control target
= control target key end

     0   :  { %10 = vsyncpa [#allocation3], 0  ;;  %s1279_s0 = inlined_call_operand.hbm [shape: f32[32,256], index: 0, kind: input, shape index: {}]   ;;  %s1280_s1 = inlined_call_operand.hbm [shape: f32[1,256], index: 1, kind: input, shape index: {}]   ;;  %s1281_s2 = inlined_call_operand.hbm [shape: f32[1,256], index: 2, kind: input, shape index: {}]   ;;  %s1282_s3 = inlined_call_operand.hbm [shape: f32[256,768], index: 3, kind: input, shape index: {}]   ;;  %s1283_s4 = inlined_call_operand.hbm [shape: f32[1,768], index: 4, kind: input, shape index: {}]   ;;  %s1284_s5 = inlined_call_operand.hbm [shape: f32[32,768], index: 5, kind: output, shape index: {}]  }
   0x1   :  { %11 = vsyncpa [#allocation6], 0 }
   0x2   :  { %12 = vsyncpa [#allocation9], 0  ;;  %s32_s20 = sshll.u32 %s1280_s1, 4  ;;  %s33_s20 = int_to_ptr.hbm [resolvable:$true] %s32_s20 }
   0x3   :  { %13 = vsyncpa [#allocation4], 0  ;;  %s1008_s21 = smov [#allocation5]   ;;  %s53_s25 = sshll.u32 %s1282_s3, 4  ;;  %s54_s25 = int_to_ptr.hbm [resolvable:$true] %s53_s25 }
   0x4   :  { %s34_s22 = sshll.u32 %s1008_s21, 4  ;;  %s1009_s26 = smov [#allocation8]   ;;  %s35_s22 = int_to_ptr.vmem [resolvable:$true] %s34_s22 }
   0x5   :  { %37 = dma.hbm_to_vmem [thread:$0]  %s33_s20, 32, %s35_s22, [#allocation6]  }
   0x6   :  { %s55_s27 = sshll.u32 %s1009_s26, 4  ;;  %s1010_s28 = smov 768   ;;  %s56_s27 = int_to_ptr.vmem [resolvable:$true] %s55_s27 }
   0x7   :  { %s1011_s29 = smov 48   ;;  %s18_s6 = sshll.u32 %s1279_s0, 4  ;;  %s19_s6 = int_to_ptr.hbm [resolvable:$true] %s18_s6 }
   0x8   :  { %61 = dma.hbm_to_vmem [thread:$0]  %s54_s25, 24576, %s56_s27, [#allocation9], %s1010_s28, %s1010_s28, %s1011_s29  }
   0x9   :  { %s1012_s7 = smov [#allocation2]   ;;  %s43_s10 = sshll.u32 %s1281_s2, 4  ;;  %s44_s10 = int_to_ptr.hbm [resolvable:$true] %s43_s10 }
   0xa   :  { %s20_s8 = sshll.u32 %s1012_s7, 4  ;;  %s1013_s11 = smov 256   ;;  %s21_s8 = int_to_ptr.vmem [resolvable:$true] %s20_s8 }
   0xb   :  { %s1014_s12 = smov 16   ;;  %s1015_s13 = smov [#allocation7]  }
   0xc   :  { %26 = dma.hbm_to_vmem [thread:$0]  %s19_s6, 1024, %s21_s8, [#allocation3], %s1013_s11, %s1013_s11, %s1014_s12  }
   0xd   :  { %s45_s14 = sshll.u32 %s1015_s13, 4  ;;  %s67_s17 = sshll.u32 %s1283_s4, 4  ;;  %s46_s14 = int_to_ptr.vmem [resolvable:$true] %s45_s14  ;;  %s68_s17 = int_to_ptr.hbm [resolvable:$true] %s67_s17 }
   0xe   :  { %48 = dma.hbm_to_vmem [thread:$0]  %s44_s10, 32, %s46_s14, [#allocation6]  }
   0xf   :  { %s1016_s0 = smov [#allocation10]  }
  0x10   :  { %s69_s18 = sshll.u32 %s1016_s0, 4  ;;  %s70_s18 = int_to_ptr.vmem [resolvable:$true] %s69_s18 }
  0x11   :  { %72 = dma.hbm_to_vmem [thread:$0]  %s68_s17, 96, %s70_s18, [#allocation9]  }
  0x12   :  { %1000 = dma.done.wait [#allocation3], 1024  }
  0x13   :  { %1001 = vsyncadd [#allocation3], 4294966272 }
  0x14   :  { %1002 = dma.done.wait [#allocation6], 64  }
  0x15   :  { %1003 = vsyncadd [#allocation6], 4294967232 }
  0x16   :  { %1004 = dma.done.wait [#allocation9], 24672  }
  0x17   :  { %1005 = vsyncadd [#allocation9], 4294942624  ;;  %v97_v0 = vld [vmem:[#allocation2 + $0x20] sm:$0xff]  ;;  %v98_v1 = vld [vmem:[#allocation2 + $0x28] sm:$0xff]  ;;  %v1017_v12 = vmov 256.0   ;;  %s1018_s2 = smov [#allocation11]  }
  0x18   :  { %v93_v2 = vld [vmem:[#allocation2] sm:$0xff]  ;;  %v109_v3 = vadd.f32 %v98_v1, %v97_v0  ;;  %v94_v4 = vld [vmem:[#allocation2 + $0x8] sm:$0xff]  ;;  %v99_v6 = vld [vmem:[#allocation2 + $0x30] sm:$0xff]  ;;  %846 = vrcp.f32 %v1017_v12  ;;  %s818_s4 = sshll.u32 %s1018_s2, 4  ;;  %s820_s21 = sshll.u32 %s1284_s5, 4  ;;  %s819_s4 = int_to_ptr.vmem [resolvable:$true] %s818_s4  ;;  %s821_s21 = int_to_ptr.hbm [resolvable:$true] %s820_s21 }
  0x19   :  { %v103_v5 = vadd.f32 %v94_v4, %v93_v2  ;;  %v100_v7 = vld [vmem:[#allocation2 + $0x38] sm:$0xff]  ;;  %v95_v8 = vld [vmem:[#allocation2 + $0x10] sm:$0xff]  ;;  %v320_v20 = vld [vmem:[#allocation8 + $0x2a0] sm:$0xff] }
  0x1a   :  { %110 = vadd.xlane.f32.xlu1 %v109_v3  ;;  %v96_v9 = vld [vmem:[#allocation2 + $0x18] sm:$0xff]  ;;  %v112_v10 = vadd.f32 %v100_v7, %v99_v6  ;;  %v416_v21 = vld [vmem:[#allocation8 + $0x5a0] sm:$0xff]  ;;  %v321_v22 = vld [vmem:[#allocation8 + $0x2a8] sm:$0xff] }
  0x1b   :  { %104 = vadd.xlane.f32.xlu0 %v103_v5  ;;  %v106_v11 = vadd.f32 %v96_v9, %v95_v8  ;;  %v326_v16 = vld [vmem:[#allocation8 + $0x2d0] sm:$0xff]  ;;  %v327_v18 = vld [vmem:[#allocation8 + $0x2d8] sm:$0xff]  ;;  %v417_v23 = vld [vmem:[#allocation8 + $0x5a8] sm:$0xff] }
  0x1c   :  { %v422_v17 = vld [vmem:[#allocation8 + $0x5d0] sm:$0xff]  ;;  %442 = vmatpush.msra.mxu0 %v326_v16  ;;  %v423_v19 = vld [vmem:[#allocation8 + $0x5d8] sm:$0xff]  ;;  %500 = vmatpush.msra.mxu2 %v327_v18  ;;  %v308_v59 = vld [vmem:[#allocation8 + $0x240] sm:$0xff] }
  0x1d   :  { %471 = vmatpush.msra.mxu1 %v422_v17  ;;  %529 = vmatpush.msra.mxu3 %v423_v19  ;;  %v314_v55 = vld [vmem:[#allocation8 + $0x270] sm:$0xff]  ;;  %v315_v57 = vld [vmem:[#allocation8 + $0x278] sm:$0xff]  ;;  %v404_v60 = vld [vmem:[#allocation8 + $0x540] sm:$0xff] }
  0x1e   :  { %v847_v13 = vpop.eup %846  ;;  %443 = vmatpush.msra.mxu0 %v320_v20  ;;  %501 = vmatpush.msra.mxu2 %v321_v22  ;;  %v410_v56 = vld [vmem:[#allocation8 + $0x570] sm:$0xff]  ;;  %v411_v58 = vld [vmem:[#allocation8 + $0x578] sm:$0xff]  ;;  %v309_v61 = vld [vmem:[#allocation8 + $0x248] sm:$0xff] }
  0x1f   :  { %v116_v14 = vmul.f32 256.0, %v847_v13  ;;  %472 = vmatpush.msra.mxu1 %v416_v21  ;;  %530 = vmatpush.msra.mxu3 %v417_v23  ;;  %vm120_vm0 = vweird.f32 %v847_v13  ;;  %v405_v62 = vld [vmem:[#allocation8 + $0x548] sm:$0xff]  ;;  %v302_v63 = vld [vmem:[#allocation8 + $0x210] sm:$0xff]  ;;  %v296_v3 = vld [vmem:[#allocation8 + $0x1e0] sm:$0xff] }
  0x20   :  { %444 = vmatpush.msra.mxu0 %v314_v55  ;;  %502 = vmatpush.msra.mxu2 %v315_v57  ;;  %v297_v5 = vld [vmem:[#allocation8 + $0x1e8] sm:$0xff]  ;;  %v380_v12 = vld [vmem:[#allocation8 + $0x480] sm:$0xff]  ;;  %v374_v16 = vld [vmem:[#allocation8 + $0x450] sm:$0xff] }
  0x21   :  { %v117_v15 = vsub.f32 1.0, %v116_v14  ;;  %473 = vmatpush.msra.mxu1 %v410_v56  ;;  %531 = vmatpush.msra.mxu3 %v411_v58  ;;  %v381_v14 = vld [vmem:[#allocation8 + $0x488] sm:$0xff]  ;;  %v279_v17 = vld [vmem:[#allocation8 + $0x158] sm:$0xff]  ;;  %v272_v19 = vld [vmem:[#allocation8 + $0x120] sm:$0xff] }
  0x22   :  { %113 = vadd.xlane.f32.xlu1 %v112_v10  ;;  %445 = vmatpush.msra.mxu0 %v308_v59  ;;  %v387_v10 = vld [vmem:[#allocation8 + $0x4b8] sm:$0xff]  ;;  %v368_v20 = vld [vmem:[#allocation8 + $0x420] sm:$0xff]  ;;  %v273_v21 = vld [vmem:[#allocation8 + $0x128] sm:$0xff] }
  0x23   :  { %107 = vadd.xlane.f32.xlu0 %v106_v11  ;;  %v118_v24 = vmul.f32 %v847_v13, %v117_v15  ;;  %474 = vmatpush.msra.mxu1 %v404_v60  ;;  %v284_v11 = vld [vmem:[#allocation8 + $0x180] sm:$0xff]  ;;  %v278_v15 = vld [vmem:[#allocation8 + $0x150] sm:$0xff]  ;;  %v375_v18 = vld [vmem:[#allocation8 + $0x458] sm:$0xff] }
  0x24   :  { %503 = vmatpush.msra.mxu2 %v309_v61  ;;  %532 = vmatpush.msra.mxu3 %v405_v62  ;;  %v369_v22 = vld [vmem:[#allocation8 + $0x428] sm:$0xff]  ;;  %v266_v23 = vld [vmem:[#allocation8 + $0xf0] sm:$0xff]  ;;  %v328_v57 = vld [vmem:[#allocation8 + $0x2e0] sm:$0xff] }
  0x25   :  { %v119_v25 = vadd.f32 %v847_v13, %v118_v24  ;;  %446 = vmatpush.msra.mxu0 %v302_v63  ;;  %v362_v24 = vld [vmem:[#allocation8 + $0x3f0] sm:$0xff]  ;;  %v333_v55 = vld [vmem:[#allocation8 + $0x308] sm:$0xff]  ;;  %v424_v58 = vld [vmem:[#allocation8 + $0x5e0] sm:$0xff] }
  0x26   :  { %v329_v56 = vld [vmem:[#allocation8 + $0x2e8] sm:$0xff]  ;;  %v323_v63 = vld [vmem:[#allocation8 + $0x2b8] sm:$0xff] }
  0x27   :  { %v1067_v26 = vsel %vm120_vm0, %v847_v13, %v119_v25  ;;  %447 = vmatpush.msra.mxu0 %v296_v3  ;;  %v285_v13 = vld [vmem:[#allocation8 + $0x188] sm:$0xff]  ;;  %v267_v25 = vld [vmem:[#allocation8 + $0xf8] sm:$0xff] }
  0x28   :  { %v425_v60 = vld [vmem:[#allocation8 + $0x5e8] sm:$0xff]  ;;  %v419_v3 = vld [vmem:[#allocation8 + $0x5b8] sm:$0xff] }
  0x8d   :  { %v111_v27 = vpop.xlane.xlu1 %110 }
  0x8e   :  { %v124_v28 = vmul.f32 %v1067_v26, %v111_v27  ;;  %v105_v29 = vpop.xlane.xlu0 %104  ;;  %v363_v27 = vld [vmem:[#allocation8 + $0x3f8] sm:$0xff] }
  0x8f   :  { %v122_v30 = vmul.f32 %v1067_v26, %v105_v29  ;;  %v356_v29 = vld [vmem:[#allocation8 + $0x3c0] sm:$0xff] }
  0x90   :  { %v1071_v31 = vsub.f32 %v97_v0, %v124_v28  ;;  %v1073_v32 = vsub.f32 %v98_v1, %v124_v28  ;;  %v398_v0 = vld [vmem:[#allocation8 + $0x510] sm:$0xff]  ;;  %v303_v1 = vld [vmem:[#allocation8 + $0x218] sm:$0xff]  ;;  %v260_v28 = vld [vmem:[#allocation8 + $0xc0] sm:$0xff] }
  0x91   :  { %v1075_v33 = vsub.f32 %v93_v2, %v122_v30  ;;  %v1077_v34 = vsub.f32 %v94_v4, %v122_v30  ;;  %475 = vmatpush.msra.mxu1 %v398_v0  ;;  %v399_v2 = vld [vmem:[#allocation8 + $0x518] sm:$0xff]  ;;  %504 = vmatpush.msra.mxu2 %v303_v1  ;;  %v392_v4 = vld [vmem:[#allocation8 + $0x4e0] sm:$0xff]  ;;  %v261_v30 = vld [vmem:[#allocation8 + $0xc8] sm:$0xff] }
  0x92   :  { %v138_v35 = vmul.f32 %v1071_v31, %v1071_v31  ;;  %v139_v36 = vmul.f32 %v1073_v32, %v1073_v32  ;;  %533 = vmatpush.msra.mxu3 %v399_v2  ;;  %v322_v0 = vld [vmem:[#allocation8 + $0x2b0] sm:$0xff] }
  0x93   :  { %v134_v37 = vmul.f32 %v1075_v33, %v1075_v33  ;;  %v135_v38 = vmul.f32 %v1077_v34, %v1077_v34  ;;  %476 = vmatpush.msra.mxu1 %v392_v4  ;;  %505 = vmatpush.msra.mxu2 %v297_v5  ;;  %v418_v1 = vld [vmem:[#allocation8 + $0x5b0] sm:$0xff]  ;;  %v317_v5 = vld [vmem:[#allocation8 + $0x288] sm:$0xff] }
  0x94   :  { %v148_v39 = vadd.f32 %v139_v36, %v138_v35  ;;  %v357_v35 = vld [vmem:[#allocation8 + $0x3c8] sm:$0xff]  ;;  %v254_v36 = vld [vmem:[#allocation8 + $0x90] sm:$0xff] }
  0x95   :  { %v114_v40 = vpop.xlane.xlu1 %113  ;;  %v142_v41 = vadd.f32 %v135_v38, %v134_v37  ;;  %v350_v37 = vld [vmem:[#allocation8 + $0x390] sm:$0xff]  ;;  %v255_v38 = vld [vmem:[#allocation8 + $0x98] sm:$0xff] }
  0x96   :  { %v125_v42 = vmul.f32 %v1067_v26, %v114_v40  ;;  %v108_v43 = vpop.xlane.xlu0 %107  ;;  %149 = vadd.xlane.f32.xlu0 %v148_v39  ;;  %v351_v39 = vld [vmem:[#allocation8 + $0x398] sm:$0xff]  ;;  %v248_v40 = vld [vmem:[#allocation8 + $0x60] sm:$0xff] }
  0x97   :  { %v123_v44 = vmul.f32 %v1067_v26, %v108_v43  ;;  %143 = vadd.xlane.f32.xlu2 %v142_v41  ;;  %v344_v41 = vld [vmem:[#allocation8 + $0x360] sm:$0xff]  ;;  %v345_v43 = vld [vmem:[#allocation8 + $0x368] sm:$0xff] }
  0x98   :  { %v1089_v45 = vsub.f32 %v99_v6, %v125_v42  ;;  %v1091_v46 = vsub.f32 %v100_v7, %v125_v42  ;;  %v393_v6 = vld [vmem:[#allocation8 + $0x4e8] sm:$0xff]  ;;  %v290_v7 = vld [vmem:[#allocation8 + $0x1b0] sm:$0xff] }
  0x99   :  { %v1093_v47 = vsub.f32 %v95_v8, %v123_v44  ;;  %v1095_v48 = vsub.f32 %v96_v9, %v123_v44  ;;  %534 = vmatpush.msra.mxu3 %v393_v6  ;;  %v386_v8 = vld [vmem:[#allocation8 + $0x4b0] sm:$0xff]  ;;  %v291_v9 = vld [vmem:[#allocation8 + $0x1b8] sm:$0xff]  ;;  %448 = vmatpush.msra.mxu0 %v290_v7  ;;  %v249_v42 = vld [vmem:[#allocation8 + $0x68] sm:$0xff] }
  0x9a   :  { %v140_v49 = vmul.f32 %v1089_v45, %v1089_v45  ;;  %v141_v50 = vmul.f32 %v1091_v46, %v1091_v46  ;;  %477 = vmatpush.msra.mxu1 %v386_v8  ;;  %506 = vmatpush.msra.mxu2 %v291_v9  ;;  %v242_v44 = vld [vmem:[#allocation8 + $0x30] sm:$0xff]  ;;  %v316_v6 = vld [vmem:[#allocation8 + $0x280] sm:$0xff]  ;;  %v413_v9 = vld [vmem:[#allocation8 + $0x588] sm:$0xff] }
  0x9b   :  { %v136_v51 = vmul.f32 %v1093_v47, %v1093_v47  ;;  %v137_v52 = vmul.f32 %v1095_v48, %v1095_v48  ;;  %535 = vmatpush.msra.mxu3 %v387_v10  ;;  %449 = vmatpush.msra.mxu0 %v284_v11  ;;  %v412_v7 = vld [vmem:[#allocation8 + $0x580] sm:$0xff]  ;;  %v311_v10 = vld [vmem:[#allocation8 + $0x258] sm:$0xff]  ;;  %v310_v11 = vld [vmem:[#allocation8 + $0x250] sm:$0xff] }
  0x9c   :  { %v151_v53 = vadd.f32 %v141_v50, %v140_v49  ;;  %478 = vmatpush.msra.mxu1 %v380_v12  ;;  %507 = vmatpush.msra.mxu2 %v285_v13  ;;  %v338_v49 = vld [vmem:[#allocation8 + $0x330] sm:$0xff]  ;;  %v243_v50 = vld [vmem:[#allocation8 + $0x38] sm:$0xff] }
  0x9d   :  { %v145_v54 = vadd.f32 %v137_v52, %v136_v51  ;;  %536 = vmatpush.msra.mxu3 %v381_v14  ;;  %450 = vmatpush.msra.mxu0 %v278_v15  ;;  %v339_v51 = vld [vmem:[#allocation8 + $0x338] sm:$0xff]  ;;  %v236_v52 = vld [vmem:[#allocation8] sm:$0xff]  ;;  %v406_v12 = vld [vmem:[#allocation8 + $0x550] sm:$0xff] }
  0x9e   :  { %152 = vadd.xlane.f32.xlu1 %v151_v53  ;;  %479 = vmatpush.msra.mxu1 %v374_v16  ;;  %v332_v53 = vld [vmem:[#allocation8 + $0x300] sm:$0xff]  ;;  %v407_v13 = vld [vmem:[#allocation8 + $0x558] sm:$0xff]  ;;  %v305_v14 = vld [vmem:[#allocation8 + $0x228] sm:$0xff] }
  0x9f   :  { %146 = vadd.xlane.f32.xlu2 %v145_v54  ;;  %508 = vmatpush.msra.mxu2 %v279_v17  ;;  %v237_v54 = vld [vmem:[#allocation8 + $0x8] sm:$0xff]  ;;  %v304_v15 = vld [vmem:[#allocation8 + $0x220] sm:$0xff] }
  0xa0   :  { %537 = vmatpush.msra.mxu3 %v375_v18  ;;  %451 = vmatpush.msra.mxu0 %v272_v19  ;;  %v400_v16 = vld [vmem:[#allocation8 + $0x520] sm:$0xff]  ;;  %v401_v18 = vld [vmem:[#allocation8 + $0x528] sm:$0xff]  ;;  %v299_v19 = vld [vmem:[#allocation8 + $0x1f8] sm:$0xff] }
  0xa1   :  { %480 = vmatpush.msra.mxu1 %v368_v20  ;;  %509 = vmatpush.msra.mxu2 %v273_v21  ;;  %v298_v20 = vld [vmem:[#allocation8 + $0x1f0] sm:$0xff] }
  0xa2   :  { %538 = vmatpush.msra.mxu3 %v369_v22  ;;  %452 = vmatpush.msra.mxu0 %v266_v23  ;;  %v394_v23 = vld [vmem:[#allocation8 + $0x4f0] sm:$0xff] }
  0xa3   :  { %481 = vmatpush.msra.mxu1 %v362_v24  ;;  %510 = vmatpush.msra.mxu2 %v267_v25  ;;  %v395_v24 = vld [vmem:[#allocation8 + $0x4f8] sm:$0xff]  ;;  %v293_v25 = vld [vmem:[#allocation8 + $0x1c8] sm:$0xff] }
  0xa4   :  { %539 = vmatpush.msra.mxu3 %v363_v27  ;;  %453 = vmatpush.msra.mxu0 %v260_v28  ;;  %v292_v28 = vld [vmem:[#allocation8 + $0x1c0] sm:$0xff] }
  0xa5   :  { %482 = vmatpush.msra.mxu1 %v356_v29  ;;  %511 = vmatpush.msra.mxu2 %v261_v30  ;;  %v388_v29 = vld [vmem:[#allocation8 + $0x4c0] sm:$0xff]  ;;  %v389_v30 = vld [vmem:[#allocation8 + $0x4c8] sm:$0xff] }
  0xa6   :  { %540 = vmatpush.msra.mxu3 %v357_v35  ;;  %454 = vmatpush.msra.mxu0 %v254_v36 }
  0xa7   :  { %483 = vmatpush.msra.mxu1 %v350_v37  ;;  %512 = vmatpush.msra.mxu2 %v255_v38  ;;  %v287_v37 = vld [vmem:[#allocation8 + $0x198] sm:$0xff]  ;;  %v286_v38 = vld [vmem:[#allocation8 + $0x190] sm:$0xff] }
  0xa8   :  { %541 = vmatpush.msra.mxu3 %v351_v39  ;;  %455 = vmatpush.msra.mxu0 %v248_v40 }
  0xa9   :  { %484 = vmatpush.msra.mxu1 %v344_v41  ;;  %513 = vmatpush.msra.mxu2 %v249_v42  ;;  %v383_v42 = vld [vmem:[#allocation8 + $0x498] sm:$0xff] }
  0xaa   :  { %542 = vmatpush.msra.mxu3 %v345_v43  ;;  %456 = vmatpush.msra.mxu0 %v242_v44 }
  0xab   :  { %485 = vmatpush.msra.mxu1 %v338_v49  ;;  %514 = vmatpush.msra.mxu2 %v243_v50  ;;  %v281_v49 = vld [vmem:[#allocation8 + $0x168] sm:$0xff]  ;;  %v280_v50 = vld [vmem:[#allocation8 + $0x160] sm:$0xff] }
  0xac   :  { %543 = vmatpush.msra.mxu3 %v339_v51  ;;  %457 = vmatpush.msra.mxu0 %v236_v52  ;;  %v376_v51 = vld [vmem:[#allocation8 + $0x460] sm:$0xff] }
  0xad   :  { %486 = vmatpush.msra.mxu1 %v332_v53  ;;  %515 = vmatpush.msra.mxu2 %v237_v54  ;;  %v377_v53 = vld [vmem:[#allocation8 + $0x468] sm:$0xff]  ;;  %v275_v54 = vld [vmem:[#allocation8 + $0x138] sm:$0xff] }
  0xae   :  { %544 = vmatpush.msra.mxu3 %v333_v55  ;;  %558 = vmatpush.msrb.mxu0 %v328_v57  ;;  %v274_v55 = vld [vmem:[#allocation8 + $0x130] sm:$0xff] }
  0xaf   :  { %616 = vmatpush.msrb.mxu2 %v329_v56  ;;  %587 = vmatpush.msrb.mxu1 %v424_v58  ;;  %v370_v57 = vld [vmem:[#allocation8 + $0x430] sm:$0xff]  ;;  %v371_v58 = vld [vmem:[#allocation8 + $0x438] sm:$0xff] }
  0xb0   :  { %645 = vmatpush.msrb.mxu3 %v425_v60  ;;  %559 = vmatpush.msrb.mxu0 %v322_v0  ;;  %v268_v60 = vld [vmem:[#allocation8 + $0x100] sm:$0xff]  ;;  %v101_v0 = vld [vmem:[#allocation5] sm:$0x3] }
  0xb1   :  { %617 = vmatpush.msrb.mxu2 %v323_v63  ;;  %588 = vmatpush.msrb.mxu1 %v418_v1 }
  0xb2   :  { %646 = vmatpush.msrb.mxu3 %v419_v3  ;;  %560 = vmatpush.msrb.mxu0 %v316_v6  ;;  %v262_v3 = vld [vmem:[#allocation8 + $0xd0] sm:$0xff]  ;;  %v102_v6 = vld [vmem:[#allocation7] sm:$0x3] }
  0xb3   :  { %618 = vmatpush.msrb.mxu2 %v317_v5  ;;  %589 = vmatpush.msrb.mxu1 %v412_v7 }
  0xb4   :  { %647 = vmatpush.msrb.mxu3 %v413_v9  ;;  %561 = vmatpush.msrb.mxu0 %v310_v11  ;;  %v358_v9 = vld [vmem:[#allocation8 + $0x3d0] sm:$0xff] }
  0xb5   :  { %619 = vmatpush.msrb.mxu2 %v311_v10  ;;  %590 = vmatpush.msrb.mxu1 %v406_v12 }
  0xb6   :  { %648 = vmatpush.msrb.mxu3 %v407_v13  ;;  %562 = vmatpush.msrb.mxu0 %v304_v15  ;;  %v359_v13 = vld [vmem:[#allocation8 + $0x3d8] sm:$0xff]  ;;  %v1144_v15 = vperm.slane %v101_v0, 1 }
  0xb7   :  { %620 = vmatpush.msrb.mxu2 %v305_v14  ;;  %591 = vmatpush.msrb.mxu1 %v400_v16  ;;  %v1142_v14 = vperm.slane %v101_v0, 0  ;;  %v1148_v16 = vperm.slane %v102_v6, 0 }
  0xb8   :  { %649 = vmatpush.msrb.mxu3 %v401_v18  ;;  %563 = vmatpush.msrb.mxu0 %v298_v20  ;;  %v257_v18 = vld [vmem:[#allocation8 + $0xa8] sm:$0xff]  ;;  %v352_v20 = vld [vmem:[#allocation8 + $0x3a0] sm:$0xff] }
  0xb9   :  { %621 = vmatpush.msrb.mxu2 %v299_v19  ;;  %592 = vmatpush.msrb.mxu1 %v394_v23  ;;  %v256_v19 = vld [vmem:[#allocation8 + $0xa0] sm:$0xff] }
  0xba   :  { %650 = vmatpush.msrb.mxu3 %v395_v24  ;;  %564 = vmatpush.msrb.mxu0 %v292_v28  ;;  %v250_v28 = vld [vmem:[#allocation8 + $0x70] sm:$0xff] }
  0xbb   :  { %622 = vmatpush.msrb.mxu2 %v293_v25  ;;  %593 = vmatpush.msrb.mxu1 %v388_v29  ;;  %v353_v25 = vld [vmem:[#allocation8 + $0x3a8] sm:$0xff] }
  0xbc   :  { %651 = vmatpush.msrb.mxu3 %v389_v30  ;;  %565 = vmatpush.msrb.mxu0 %v286_v38  ;;  %v347_v38 = vld [vmem:[#allocation8 + $0x378] sm:$0xff] }
  0xbd   :  { %623 = vmatpush.msrb.mxu2 %v287_v37  ;;  %v346_v37 = vld [vmem:[#allocation8 + $0x370] sm:$0xff] }
  0xbe   :  { %652 = vmatpush.msrb.mxu3 %v383_v42  ;;  %566 = vmatpush.msrb.mxu0 %v280_v50  ;;  %v288_v50 = vld [vmem:[#allocation8 + $0x1a0] sm:$0xff] }
  0xbf   :  { %624 = vmatpush.msrb.mxu2 %v281_v49 }
  0xc0   :  { %653 = vmatpush.msrb.mxu3 %v377_v53  ;;  %567 = vmatpush.msrb.mxu0 %v274_v55  ;;  %v341_v53 = vld [vmem:[#allocation8 + $0x348] sm:$0xff]  ;;  %v334_v55 = vld [vmem:[#allocation8 + $0x310] sm:$0xff] }
  0xc1   :  { %625 = vmatpush.msrb.mxu2 %v275_v54  ;;  %v239_v54 = vld [vmem:[#allocation8 + $0x18] sm:$0xff] }
  0xc2   :  { %654 = vmatpush.msrb.mxu3 %v371_v58  ;;  %568 = vmatpush.msrb.mxu0 %v268_v60 }
  0xc4   :  { %569 = vmatpush.msrb.mxu0 %v262_v3 }
  0xc6   :  { %570 = vmatpush.msrb.mxu0 %v256_v19  ;;  %v408_v19 = vld [vmem:[#allocation8 + $0x560] sm:$0xff] }
  0xc8   :  { %571 = vmatpush.msrb.mxu0 %v250_v28 }
 0x109   :  { %v150_v59 = vpop.xlane.xlu0 %149 }
 0x10a   :  { %v144_v61 = vpop.xlane.xlu2 %143  ;;  %v156_v62 = vmul.f32 %v150_v59, %v1067_v26  ;;  %v269_v59 = vld [vmem:[#allocation8 + $0x108] sm:$0xff] }
 0x10b   :  { %v154_v2 = vmul.f32 %v144_v61, %v1067_v26  ;;  %v364_v61 = vld [vmem:[#allocation8 + $0x400] sm:$0xff]  ;;  %626 = vmatpush.msrb.mxu2 %v269_v59 }
 0x10c   :  { %v1107_v4 = vadd.f32 1e-05, %v156_v62  ;;  %v365_v62 = vld [vmem:[#allocation8 + $0x408] sm:$0xff] }
 0x10d   :  { %v1109_v8 = vadd.f32 1e-05, %v154_v2  ;;  %v263_v2 = vld [vmem:[#allocation8 + $0xd8] sm:$0xff]  ;;  %655 = vmatpush.msrb.mxu3 %v365_v62  ;;  %v426_v62 = vld [vmem:[#allocation8 + $0x5f0] sm:$0xff] }
 0x10e   :  { %848 = vrsqrt.f32 %v1107_v4  ;;  %627 = vmatpush.msrb.mxu2 %v263_v2  ;;  %vm188_vm4 = vweird.f32 %v1107_v4  ;;  %v325_v2 = vld [vmem:[#allocation8 + $0x2c8] sm:$0xff] }
 0x10f   :  { %850 = vrsqrt.f32 %v1109_v8  ;;  %vm168_vm2 = vweird.f32 %v1109_v8  ;;  %656 = vmatpush.msrb.mxu3 %v359_v13  ;;  %v415_v13 = vld [vmem:[#allocation8 + $0x598] sm:$0xff] }
 0x110   :  { %628 = vmatpush.msrb.mxu2 %v257_v18  ;;  %v312_v18 = vld [vmem:[#allocation8 + $0x260] sm:$0xff] }
 0x111   :  { %v153_v17 = vpop.xlane.xlu1 %152  ;;  %657 = vmatpush.msrb.mxu3 %v353_v25  ;;  %v402_v25 = vld [vmem:[#allocation8 + $0x530] sm:$0xff] }
 0x112   :  { %v157_v21 = vmul.f32 %v153_v17, %v1067_v26  ;;  %v147_v22 = vpop.xlane.xlu2 %146 }
 0x113   :  { %v155_v27 = vmul.f32 %v147_v22, %v1067_v26  ;;  %v382_v26 = vld [vmem:[#allocation8 + $0x490] sm:$0xff]  ;;  %658 = vmatpush.msrb.mxu3 %v347_v38  ;;  %v300_v38 = vld [vmem:[#allocation8 + $0x200] sm:$0xff] }
 0x114   :  { %v1115_v35 = vpop.eup %848  ;;  %v1117_v36 = vadd.f32 1e-05, %v157_v21  ;;  %594 = vmatpush.msrb.mxu1 %v382_v26  ;;  %v1152_v21 = vperm.slane %v102_v6, 1  ;;  %v340_v26 = vld [vmem:[#allocation8 + $0x340] sm:$0xff] }
 0x115   :  { %v1119_v39 = vpop.eup %850  ;;  %v183_v40 = vmul.f32 %v1115_v35, %v1107_v4  ;;  %v1123_v41 = vadd.f32 1e-05, %v155_v27  ;;  %v251_v27 = vld [vmem:[#allocation8 + $0x78] sm:$0xff]  ;;  %vm189_vm5 = vweird.f32 %v1115_v35  ;;  %v238_v4 = vld [vmem:[#allocation8 + $0x10] sm:$0xff]  ;;  %659 = vmatpush.msrb.mxu3 %v341_v53  ;;  %v420_v6 = vld [vmem:[#allocation8 + $0x5c0] sm:$0xff] }
 0x116   :  { %v163_v43 = vmul.f32 %v1119_v39, %v1109_v8  ;;  %852 = vrsqrt.f32 %v1117_v36  ;;  %595 = vmatpush.msrb.mxu1 %v376_v51  ;;  %vm169_vm1 = vweird.f32 %v1119_v39  ;;  %629 = vmatpush.msrb.mxu2 %v251_v27  ;;  %vm1171_vm7 = vmor %vm188_vm4, %vm189_vm5  ;;  %vm198_vm10 = vweird.f32 %v1117_v36  ;;  %v283_v53 = vld [vmem:[#allocation8 + $0x178] sm:$0xff] }
 0x117   :  { %854 = vrsqrt.f32 %v1123_v41  ;;  %v184_v52 = vmul.f32 %v1115_v35, %v183_v40  ;;  %vm170_vm3 = vmor %vm168_vm2, %vm169_vm1  ;;  %vm178_vm8 = vweird.f32 %v1123_v41 }
 0x118   :  { %v164_v44 = vmul.f32 %v1119_v39, %v163_v43  ;;  %596 = vmatpush.msrb.mxu1 %v370_v57  ;;  %v331_v57 = vld [vmem:[#allocation8 + $0x2f8] sm:$0xff] }
 0x119   :  { %v185_v7 = vmul.f32 0.5, %v184_v52 }
 0x11a   :  { %v165_v56 = vmul.f32 0.5, %v164_v44  ;;  %597 = vmatpush.msrb.mxu1 %v364_v61  ;;  %v330_v61 = vld [vmem:[#allocation8 + $0x2f0] sm:$0xff] }
 0x11b   :  { %v186_v24 = vsub.f32 1.5, %v185_v7 }
 0x11c   :  { %v1131_v63 = vpop.eup %852  ;;  %v166_v1 = vsub.f32 1.5, %v165_v56  ;;  %598 = vmatpush.msrb.mxu1 %v358_v9 }
 0x11d   :  { %v1134_v5 = vpop.eup %854  ;;  %v193_v11 = vmul.f32 %v1131_v63, %v1117_v36  ;;  %v187_v49 = vmul.f32 %v1115_v35, %v186_v24  ;;  %vm199_vm11 = vweird.f32 %v1131_v63  ;;  %v319_v36 = vld [vmem:[#allocation8 + $0x298] sm:$0xff]  ;;  %v306_v24 = vld [vmem:[#allocation8 + $0x230] sm:$0xff] }
 0x11e   :  { %v167_v10 = vmul.f32 %v1119_v39, %v166_v1  ;;  %v173_v12 = vmul.f32 %v1134_v5, %v1123_v41  ;;  %599 = vmatpush.msrb.mxu1 %v352_v20  ;;  %vm179_vm6 = vweird.f32 %v1134_v5  ;;  %v335_v41 = vld [vmem:[#allocation8 + $0x318] sm:$0xff]  ;;  %vm200_vm12 = vmor %vm198_vm10, %vm199_vm11 }
 0x11f   :  { %v194_v29 = vmul.f32 %v1131_v63, %v193_v11  ;;  %vm180_vm9 = vmor %vm178_vm8, %vm179_vm6  ;;  %v191_v58 = vsel %vm1171_vm7, %v1115_v35, %v187_v49  ;;  %v427_v1 = vld [vmem:[#allocation8 + $0x5f8] sm:$0xff]  ;;  %660 = vmatpush.msrb.mxu3 %v335_v41  ;;  %v324_v35 = vld [vmem:[#allocation8 + $0x2c0] sm:$0xff] }
 0x120   :  { %v171_v8 = vsel %vm170_vm3, %v1119_v39, %v167_v10  ;;  %v174_v17 = vmul.f32 %v1134_v5, %v173_v12  ;;  %v245_v39 = vld [vmem:[#allocation8 + $0x48] sm:$0xff]  ;;  %600 = vmatpush.msrb.mxu1 %v346_v37  ;;  %v414_v11 = vld [vmem:[#allocation8 + $0x590] sm:$0xff] }
 0x121   :  { %v202_v22 = vmul.f32 %v171_v8, %v1075_v33  ;;  %v203_v23 = vmul.f32 %v171_v8, %v1077_v34  ;;  %v244_v34 = vld [vmem:[#allocation8 + $0x40] sm:$0xff]  ;;  %630 = vmatpush.msrb.mxu2 %v245_v39  ;;  %v195_v51 = vmul.f32 0.5, %v194_v29  ;;  %v313_v8 = vld [vmem:[#allocation8 + $0x268] sm:$0xff] }
 0x122   :  { %v175_v30 = vmul.f32 0.5, %v174_v17  ;;  %572 = vmatpush.msrb.mxu0 %v244_v34  ;;  %601 = vmatpush.msrb.mxu1 %v340_v26  ;;  %v301_v37 = vld [vmem:[#allocation8 + $0x208] sm:$0xff]  ;;  %v396_v39 = vld [vmem:[#allocation8 + $0x500] sm:$0xff]  ;;  %v294_v34 = vld [vmem:[#allocation8 + $0x1d0] sm:$0xff] }
 0x123   :  { %v215_v40 = vmul.f32 %v1142_v14, %v202_v22  ;;  %v216_v33 = vmul.f32 %v1144_v15, %v203_v23  ;;  %631 = vmatpush.msrb.mxu2 %v239_v54  ;;  %v196_v0 = vsub.f32 1.5, %v195_v51  ;;  %v409_v22 = vld [vmem:[#allocation8 + $0x568] sm:$0xff]  ;;  %v307_v23 = vld [vmem:[#allocation8 + $0x238] sm:$0xff]  ;;  %v390_v26 = vld [vmem:[#allocation8 + $0x4d0] sm:$0xff] }
 0x124   :  { %v176_v42 = vsub.f32 1.5, %v175_v30  ;;  %573 = vmatpush.msrb.mxu0 %v238_v4  ;;  %602 = vmatpush.msrb.mxu1 %v334_v55  ;;  %v403_v30 = vld [vmem:[#allocation8 + $0x538] sm:$0xff]  ;;  %v289_v49 = vld [vmem:[#allocation8 + $0x1a8] sm:$0xff]  ;;  %v384_v51 = vld [vmem:[#allocation8 + $0x4a0] sm:$0xff] }
 0x125   :  { %v1163_v43 = vadd.f32 %v1148_v16, %v215_v40  ;;  %v1166_v44 = vadd.f32 %v1152_v21, %v216_v33  ;;  %v197_v10 = vmul.f32 %v1131_v63, %v196_v0  ;;  %v397_v40 = vld [vmem:[#allocation8 + $0x508] sm:$0xff]  ;;  %v282_v54 = vld [vmem:[#allocation8 + $0x170] sm:$0xff]  ;;  %v360_v0 = vld [vmem:[#allocation8 + $0x3e0] sm:$0xff] }
 0x126   :  { %v177_v52 = vmul.f32 %v1134_v5, %v176_v42  ;;  %v391_v42 = vld [vmem:[#allocation8 + $0x4d8] sm:$0xff]  ;;  %v378_v4 = vld [vmem:[#allocation8 + $0x470] sm:$0xff]  ;;  %v277_v55 = vld [vmem:[#allocation8 + $0x148] sm:$0xff] }
 0x127   :  { %458 = vmatmul.f32.vlgmr.msra.gmra.mxu0 %v1163_v43  ;;  %487 = vmatmul.f32.vlgmr.msra.gmra.mxu1 %v1166_v44  ;;  %v201_v20 = vsel %vm200_vm12, %v1131_v63, %v197_v10  ;;  %v373_v41 = vld [vmem:[#allocation8 + $0x448] sm:$0xff] }
 0x128   :  { %v181_v56 = vsel %vm180_vm9, %v1134_v5, %v177_v52  ;;  %516 = vmatmul.f32.vlgmr.msra.gmra.mxu2 %v1163_v43  ;;  %545 = vmatmul.f32.vlgmr.msra.gmra.mxu3 %v1166_v44  ;;  %v208_v29 = vmul.f32 %v201_v20, %v1089_v45  ;;  %v209_v63 = vmul.f32 %v201_v20, %v1091_v46  ;;  %v295_v45 = vld [vmem:[#allocation8 + $0x1d8] sm:$0xff]  ;;  %v349_v10 = vld [vmem:[#allocation8 + $0x388] sm:$0xff] }
 0x129   :  { %v204_v59 = vmul.f32 %v181_v56, %v1093_v47  ;;  %v205_v60 = vmul.f32 %v181_v56, %v1095_v48  ;;  %732 = vmatpush.msra.mxu2 %v331_v57  ;;  %v206_v47 = vmul.f32 %v191_v58, %v1071_v31  ;;  %674 = vmatpush.msra.mxu0 %v330_v61  ;;  %v421_v31 = vld [vmem:[#allocation8 + $0x5c8] sm:$0xff]  ;;  %v372_v56 = vld [vmem:[#allocation8 + $0x440] sm:$0xff]  ;;  %v271_v57 = vld [vmem:[#allocation8 + $0x118] sm:$0xff] }
 0x12a   :  { %703 = vmatpush.msra.mxu1 %v426_v62  ;;  %v207_v48 = vmul.f32 %v191_v58, %v1073_v32  ;;  %761 = vmatpush.msra.mxu3 %v427_v1  ;;  %v318_v32 = vld [vmem:[#allocation8 + $0x290] sm:$0xff]  ;;  %v221_v46 = vmul.f32 %v1142_v14, %v208_v29  ;;  %v222_v33 = vmul.f32 %v1144_v15, %v209_v63  ;;  %v265_v61 = vld [vmem:[#allocation8 + $0xe8] sm:$0xff]  ;;  %v264_v62 = vld [vmem:[#allocation8 + $0xe0] sm:$0xff] }
 0x12b   :  { %v217_v3 = vmul.f32 %v1142_v14, %v204_v59  ;;  %v218_v5 = vmul.f32 %v1144_v15, %v205_v60  ;;  %733 = vmatpush.msra.mxu2 %v325_v2  ;;  %675 = vmatpush.msra.mxu0 %v324_v35  ;;  %v219_v12 = vmul.f32 %v1142_v14, %v206_v47  ;;  %v270_v58 = vld [vmem:[#allocation8 + $0x110] sm:$0xff]  ;;  %v367_v60 = vld [vmem:[#allocation8 + $0x418] sm:$0xff]  ;;  %v361_v1 = vld [vmem:[#allocation8 + $0x3e8] sm:$0xff] }
 0x12c   :  { %704 = vmatpush.msra.mxu1 %v420_v6  ;;  %v220_v17 = vmul.f32 %v1144_v15, %v207_v48  ;;  %762 = vmatpush.msra.mxu3 %v421_v31  ;;  %v1224_v52 = vadd.f32 %v1148_v16, %v221_v46  ;;  %v1227_v14 = vadd.f32 %v1152_v21, %v222_v33  ;;  %v385_v15 = vld [vmem:[#allocation8 + $0x4a8] sm:$0xff]  ;;  %v366_v59 = vld [vmem:[#allocation8 + $0x410] sm:$0xff]  ;;  %v259_v2 = vld [vmem:[#allocation8 + $0xb8] sm:$0xff] }
 0x12d   :  { %v1196_v7 = vadd.f32 %v1148_v16, %v217_v3  ;;  %v1199_v9 = vadd.f32 %v1152_v21, %v218_v5  ;;  %734 = vmatpush.msra.mxu2 %v319_v36  ;;  %676 = vmatpush.msra.mxu0 %v318_v32  ;;  %v1210_v27 = vadd.f32 %v1148_v16, %v219_v12  ;;  %v379_v16 = vld [vmem:[#allocation8 + $0x478] sm:$0xff]  ;;  %v258_v3 = vld [vmem:[#allocation8 + $0xb0] sm:$0xff]  ;;  %v253_v6 = vld [vmem:[#allocation8 + $0x88] sm:$0xff] }
 0x12e   :  { %705 = vmatpush.msra.mxu1 %v414_v11  ;;  %763 = vmatpush.msra.mxu3 %v415_v13  ;;  %v1213_v28 = vadd.f32 %v1152_v21, %v220_v17  ;;  %v276_v21 = vld [vmem:[#allocation8 + $0x140] sm:$0xff]  ;;  %v354_v5 = vld [vmem:[#allocation8 + $0x3b0] sm:$0xff]  ;;  %v355_v35 = vld [vmem:[#allocation8 + $0x3b8] sm:$0xff] }
 0x12f   :  { %461 = vmatmul.f32.gmra.mxu0 %v1196_v7  ;;  %490 = vmatmul.f32.gmra.mxu1 %v1199_v9  ;;  %v252_v47 = vld [vmem:[#allocation8 + $0x80] sm:$0xff]  ;;  %v247_v31 = vld [vmem:[#allocation8 + $0x58] sm:$0xff]  ;;  %v246_v36 = vld [vmem:[#allocation8 + $0x50] sm:$0xff] }
 0x130   :  { %519 = vmatmul.f32.gmra.mxu2 %v1196_v7  ;;  %548 = vmatmul.f32.gmra.mxu3 %v1199_v9  ;;  %v348_v48 = vld [vmem:[#allocation8 + $0x380] sm:$0xff]  ;;  %v342_v32 = vld [vmem:[#allocation8 + $0x350] sm:$0xff]  ;;  %v343_v11 = vld [vmem:[#allocation8 + $0x358] sm:$0xff] }
 0x131   :  { %735 = vmatpush.msra.mxu2 %v313_v8  ;;  %677 = vmatpush.msra.mxu0 %v312_v18  ;;  %v241_v12 = vld [vmem:[#allocation8 + $0x28] sm:$0xff]  ;;  %v240_v13 = vld [vmem:[#allocation8 + $0x20] sm:$0xff] }
 0x132   :  { %706 = vmatpush.msra.mxu1 %v408_v19  ;;  %764 = vmatpush.msra.mxu3 %v409_v22  ;;  %v336_v8 = vld [vmem:[#allocation8 + $0x320] sm:$0xff]  ;;  %v337_v17 = vld [vmem:[#allocation8 + $0x328] sm:$0xff] }
 0x133   :  { %736 = vmatpush.msra.mxu2 %v307_v23  ;;  %678 = vmatpush.msra.mxu0 %v306_v24 }
 0x134   :  { %707 = vmatpush.msra.mxu1 %v402_v25  ;;  %765 = vmatpush.msra.mxu3 %v403_v30 }
 0x135   :  { %737 = vmatpush.msra.mxu2 %v301_v37  ;;  %679 = vmatpush.msra.mxu0 %v300_v38 }
 0x136   :  { %708 = vmatpush.msra.mxu1 %v396_v39  ;;  %766 = vmatpush.msra.mxu3 %v397_v40 }
 0x137   :  { %464 = vmatmul.f32.gmra.mxu0 %v1210_v27  ;;  %493 = vmatmul.f32.gmra.mxu1 %v1213_v28 }
 0x138   :  { %522 = vmatmul.f32.gmra.mxu2 %v1210_v27  ;;  %551 = vmatmul.f32.gmra.mxu3 %v1213_v28 }
 0x139   :  { %738 = vmatpush.msra.mxu2 %v295_v45  ;;  %680 = vmatpush.msra.mxu0 %v294_v34 }
 0x13a   :  { %709 = vmatpush.msra.mxu1 %v390_v26  ;;  %767 = vmatpush.msra.mxu3 %v391_v42 }
 0x13b   :  { %739 = vmatpush.msra.mxu2 %v289_v49  ;;  %681 = vmatpush.msra.mxu0 %v288_v50 }
 0x13c   :  { %710 = vmatpush.msra.mxu1 %v384_v51  ;;  %768 = vmatpush.msra.mxu3 %v385_v15 }
 0x13d   :  { %740 = vmatpush.msra.mxu2 %v283_v53  ;;  %682 = vmatpush.msra.mxu0 %v282_v54 }
 0x13e   :  { %711 = vmatpush.msra.mxu1 %v378_v4  ;;  %769 = vmatpush.msra.mxu3 %v379_v16 }
 0x13f   :  { %467 = vmatmul.f32.gmra.mxu0 %v1224_v52  ;;  %496 = vmatmul.f32.gmra.mxu1 %v1227_v14 }
 0x140   :  { %525 = vmatmul.f32.gmra.mxu2 %v1224_v52  ;;  %554 = vmatmul.f32.gmra.mxu3 %v1227_v14 }
 0x141   :  { %741 = vmatpush.msra.mxu2 %v277_v55  ;;  %683 = vmatpush.msra.mxu0 %v276_v21 }
 0x142   :  { %712 = vmatpush.msra.mxu1 %v372_v56  ;;  %770 = vmatpush.msra.mxu3 %v373_v41 }
 0x143   :  { %742 = vmatpush.msra.mxu2 %v271_v57  ;;  %684 = vmatpush.msra.mxu0 %v270_v58 }
 0x144   :  { %713 = vmatpush.msra.mxu1 %v366_v59  ;;  %771 = vmatpush.msra.mxu3 %v367_v60 }
 0x145   :  { %743 = vmatpush.msra.mxu2 %v265_v61  ;;  %685 = vmatpush.msra.mxu0 %v264_v62 }
 0x146   :  { %714 = vmatpush.msra.mxu1 %v360_v0  ;;  %772 = vmatpush.msra.mxu3 %v361_v1 }
 0x147   :  { %574 = vmatmul.f32.vlgmr.msrb.gmra.mxu0 %v1163_v43  ;;  %603 = vmatmul.f32.vlgmr.msrb.gmra.mxu1 %v1166_v44 }
 0x148   :  { %632 = vmatmul.f32.vlgmr.msrb.gmra.mxu2 %v1163_v43  ;;  %661 = vmatmul.f32.vlgmr.msrb.gmra.mxu3 %v1166_v44 }
 0x149   :  { %744 = vmatpush.msra.mxu2 %v259_v2  ;;  %686 = vmatpush.msra.mxu0 %v258_v3 }
 0x14a   :  { %715 = vmatpush.msra.mxu1 %v354_v5  ;;  %773 = vmatpush.msra.mxu3 %v355_v35 }
 0x14b   :  { %745 = vmatpush.msra.mxu2 %v253_v6  ;;  %687 = vmatpush.msra.mxu0 %v252_v47 }
 0x14c   :  { %716 = vmatpush.msra.mxu1 %v348_v48  ;;  %774 = vmatpush.msra.mxu3 %v349_v10 }
 0x14d   :  { %746 = vmatpush.msra.mxu2 %v247_v31  ;;  %688 = vmatpush.msra.mxu0 %v246_v36 }
 0x14e   :  { %717 = vmatpush.msra.mxu1 %v342_v32  ;;  %775 = vmatpush.msra.mxu3 %v343_v11 }
 0x14f   :  { %577 = vmatmul.f32.gmra.mxu0 %v1196_v7  ;;  %606 = vmatmul.f32.gmra.mxu1 %v1199_v9 }
 0x150   :  { %635 = vmatmul.f32.gmra.mxu2 %v1196_v7  ;;  %664 = vmatmul.f32.gmra.mxu3 %v1199_v9 }
 0x151   :  { %747 = vmatpush.msra.mxu2 %v241_v12  ;;  %689 = vmatpush.msra.mxu0 %v240_v13 }
 0x152   :  { %718 = vmatpush.msra.mxu1 %v336_v8  ;;  %776 = vmatpush.msra.mxu3 %v337_v17 }
 0x157   :  { %580 = vmatmul.f32.gmra.mxu0 %v1210_v27  ;;  %609 = vmatmul.f32.gmra.mxu1 %v1213_v28 }
 0x158   :  { %638 = vmatmul.f32.gmra.mxu2 %v1210_v27  ;;  %667 = vmatmul.f32.gmra.mxu3 %v1213_v28 }
 0x15f   :  { %583 = vmatmul.f32.gmra.mxu0 %v1224_v52  ;;  %612 = vmatmul.f32.gmra.mxu1 %v1227_v14 }
 0x160   :  { %641 = vmatmul.f32.gmra.mxu2 %v1224_v52  ;;  %670 = vmatmul.f32.gmra.mxu3 %v1227_v14 }
 0x167   :  { %690 = vmatmul.f32.vlgmr.msra.gmra.mxu0 %v1163_v43  ;;  %719 = vmatmul.f32.vlgmr.msra.gmra.mxu1 %v1166_v44 }
 0x168   :  { %748 = vmatmul.f32.vlgmr.msra.gmra.mxu2 %v1163_v43  ;;  %777 = vmatmul.f32.vlgmr.msra.gmra.mxu3 %v1166_v44  ;;  %v1265_v43 = vld [vmem:[#allocation10] sm:$0x3f] }
 0x169   :  { %v430_v44 = vperm.slane %v1265_v43, 0  ;;  %v431_v20 = vperm.slane %v1265_v43, 1  ;;  %v432_v15 = vperm.slane %v1265_v43, 2  ;;  %v433_v57 = vperm.slane %v1265_v43, 3 }
 0x16f   :  { %693 = vmatmul.f32.gmra.mxu0 %v1196_v7  ;;  %722 = vmatmul.f32.gmra.mxu1 %v1199_v9 }
 0x170   :  { %751 = vmatmul.f32.gmra.mxu2 %v1196_v7  ;;  %780 = vmatmul.f32.gmra.mxu3 %v1199_v9 }
 0x177   :  { %696 = vmatmul.f32.gmra.mxu0 %v1210_v27  ;;  %725 = vmatmul.f32.gmra.mxu1 %v1213_v28 }
 0x178   :  { %754 = vmatmul.f32.gmra.mxu2 %v1210_v27  ;;  %783 = vmatmul.f32.gmra.mxu3 %v1213_v28 }
 0x17f   :  { %699 = vmatmul.f32.gmra.mxu0 %v1224_v52  ;;  %728 = vmatmul.f32.gmra.mxu1 %v1227_v14 }
 0x180   :  { %757 = vmatmul.f32.gmra.mxu2 %v1224_v52  ;;  %786 = vmatmul.f32.gmra.mxu3 %v1227_v14 }
 0x1a4   :  { %v459_v7 = vpop.f32.mrf.mxu0  ;;  %v488_v9 = vpop.f32.mrf.mxu1 }
 0x1a5   :  { %v460_v18 = vadd.f32 %v459_v7, %v430_v44  ;;  %v434_v7 = vperm.slane %v1265_v43, 4 }
 0x1a7   :  { %v489_v19 = vadd.f32 %v488_v9, %v460_v18 }
 0x1a9   :  { %790 = vst [vmem:[#allocation11] sm:$0xff] %v489_v19 }
 0x1ab   :  { %v517_v22 = vpop.f32.mrf.mxu2  ;;  %v546_v23 = vpop.f32.mrf.mxu3 }
 0x1ac   :  { %v518_v24 = vadd.f32 %v517_v22, %v431_v20  ;;  %v462_v25 = vpop.f32.mrf.mxu0  ;;  %v491_v27 = vpop.f32.mrf.mxu1 }
 0x1ad   :  { %v463_v28 = vadd.f32 %v462_v25, %v430_v44 }
 0x1ae   :  { %v547_v29 = vadd.f32 %v546_v23, %v518_v24 }
 0x1af   :  { %v492_v63 = vadd.f32 %v491_v27, %v463_v28  ;;  %v435_v27 = vperm.slane %v1265_v43, 5 }
 0x1b0   :  { %791 = vst [vmem:[#allocation11 + $0x8] sm:$0xff] %v547_v29 }
 0x1b1   :  { %796 = vst [vmem:[#allocation11 + $0x30] sm:$0xff] %v492_v63 }
 0x1b3   :  { %v520_v30 = vpop.f32.mrf.mxu2  ;;  %v549_v37 = vpop.f32.mrf.mxu3 }
 0x1b4   :  { %v521_v38 = vadd.f32 %v520_v30, %v431_v20  ;;  %v465_v39 = vpop.f32.mrf.mxu0  ;;  %v494_v40 = vpop.f32.mrf.mxu1 }
 0x1b5   :  { %v466_v45 = vadd.f32 %v465_v39, %v430_v44 }
 0x1b6   :  { %v550_v46 = vadd.f32 %v549_v37, %v521_v38 }
 0x1b7   :  { %v495_v33 = vadd.f32 %v494_v40, %v466_v45 }
 0x1b8   :  { %797 = vst [vmem:[#allocation11 + $0x38] sm:$0xff] %v550_v46 }
 0x1b9   :  { %802 = vst [vmem:[#allocation11 + $0x60] sm:$0xff] %v495_v33 }
 0x1bb   :  { %v523_v34 = vpop.f32.mrf.mxu2  ;;  %v552_v26 = vpop.f32.mrf.mxu3 }
 0x1bc   :  { %v524_v42 = vadd.f32 %v523_v34, %v431_v20  ;;  %v468_v49 = vpop.f32.mrf.mxu0  ;;  %v497_v50 = vpop.f32.mrf.mxu1 }
 0x1bd   :  { %v469_v51 = vadd.f32 %v468_v49, %v430_v44 }
 0x1be   :  { %v553_v52 = vadd.f32 %v552_v26, %v524_v42 }
 0x1bf   :  { %v498_v14 = vadd.f32 %v497_v50, %v469_v51 }
 0x1c0   :  { %803 = vst [vmem:[#allocation11 + $0x68] sm:$0xff] %v553_v52 }
 0x1c1   :  { %808 = vst [vmem:[#allocation11 + $0x90] sm:$0xff] %v498_v14 }
 0x1c3   :  { %v526_v53 = vpop.f32.mrf.mxu2  ;;  %v555_v54 = vpop.f32.mrf.mxu3 }
 0x1c4   :  { %v527_v4 = vadd.f32 %v526_v53, %v431_v20  ;;  %v575_v16 = vpop.f32.mrf.mxu0  ;;  %v604_v55 = vpop.f32.mrf.mxu1 }
 0x1c5   :  { %v576_v21 = vadd.f32 %v575_v16, %v432_v15 }
 0x1c6   :  { %v556_v56 = vadd.f32 %v555_v54, %v527_v4 }
 0x1c7   :  { %v605_v41 = vadd.f32 %v604_v55, %v576_v21 }
 0x1c8   :  { %809 = vst [vmem:[#allocation11 + $0x98] sm:$0xff] %v556_v56 }
 0x1c9   :  { %792 = vst [vmem:[#allocation11 + $0x10] sm:$0xff] %v605_v41 }
 0x1cb   :  { %v633_v58 = vpop.f32.mrf.mxu2  ;;  %v662_v59 = vpop.f32.mrf.mxu3 }
 0x1cc   :  { %v634_v60 = vadd.f32 %v633_v58, %v433_v57  ;;  %v578_v61 = vpop.f32.mrf.mxu0  ;;  %v607_v62 = vpop.f32.mrf.mxu1 }
 0x1cd   :  { %v579_v0 = vadd.f32 %v578_v61, %v432_v15 }
 0x1ce   :  { %v663_v1 = vadd.f32 %v662_v59, %v634_v60 }
 0x1cf   :  { %v608_v2 = vadd.f32 %v607_v62, %v579_v0 }
 0x1d0   :  { %793 = vst [vmem:[#allocation11 + $0x18] sm:$0xff] %v663_v1 }
 0x1d1   :  { %798 = vst [vmem:[#allocation11 + $0x40] sm:$0xff] %v608_v2 }
 0x1d3   :  { %v636_v3 = vpop.f32.mrf.mxu2  ;;  %v665_v5 = vpop.f32.mrf.mxu3 }
 0x1d4   :  { %v637_v35 = vadd.f32 %v636_v3, %v433_v57  ;;  %v581_v6 = vpop.f32.mrf.mxu0  ;;  %v610_v47 = vpop.f32.mrf.mxu1 }
 0x1d5   :  { %v582_v48 = vadd.f32 %v581_v6, %v432_v15 }
 0x1d6   :  { %v666_v10 = vadd.f32 %v665_v5, %v637_v35 }
 0x1d7   :  { %v611_v31 = vadd.f32 %v610_v47, %v582_v48 }
 0x1d8   :  { %799 = vst [vmem:[#allocation11 + $0x48] sm:$0xff] %v666_v10 }
 0x1d9   :  { %804 = vst [vmem:[#allocation11 + $0x70] sm:$0xff] %v611_v31 }
 0x1db   :  { %v639_v36 = vpop.f32.mrf.mxu2  ;;  %v668_v32 = vpop.f32.mrf.mxu3 }
 0x1dc   :  { %v640_v11 = vadd.f32 %v639_v36, %v433_v57  ;;  %v584_v12 = vpop.f32.mrf.mxu0  ;;  %v613_v13 = vpop.f32.mrf.mxu1 }
 0x1dd   :  { %v585_v8 = vadd.f32 %v584_v12, %v432_v15 }
 0x1de   :  { %v669_v17 = vadd.f32 %v668_v32, %v640_v11 }
 0x1df   :  { %v614_v44 = vadd.f32 %v613_v13, %v585_v8 }
 0x1e0   :  { %805 = vst [vmem:[#allocation11 + $0x78] sm:$0xff] %v669_v17 }
 0x1e1   :  { %810 = vst [vmem:[#allocation11 + $0xa0] sm:$0xff] %v614_v44 }
 0x1e3   :  { %v642_v9 = vpop.f32.mrf.mxu2  ;;  %v671_v18 = vpop.f32.mrf.mxu3 }
 0x1e4   :  { %v643_v19 = vadd.f32 %v642_v9, %v433_v57  ;;  %v691_v20 = vpop.f32.mrf.mxu0  ;;  %v720_v22 = vpop.f32.mrf.mxu1 }
 0x1e5   :  { %v692_v23 = vadd.f32 %v691_v20, %v434_v7 }
 0x1e6   :  { %v672_v24 = vadd.f32 %v671_v18, %v643_v19 }
 0x1e7   :  { %v721_v25 = vadd.f32 %v720_v22, %v692_v23 }
 0x1e8   :  { %811 = vst [vmem:[#allocation11 + $0xa8] sm:$0xff] %v672_v24 }
 0x1e9   :  { %794 = vst [vmem:[#allocation11 + $0x20] sm:$0xff] %v721_v25 }
 0x1eb   :  { %v749_v28 = vpop.f32.mrf.mxu2  ;;  %v778_v29 = vpop.f32.mrf.mxu3 }
 0x1ec   :  { %v750_v63 = vadd.f32 %v749_v28, %v435_v27  ;;  %v694_v30 = vpop.f32.mrf.mxu0  ;;  %v723_v37 = vpop.f32.mrf.mxu1 }
 0x1ed   :  { %v695_v38 = vadd.f32 %v694_v30, %v434_v7 }
 0x1ee   :  { %v779_v39 = vadd.f32 %v778_v29, %v750_v63 }
 0x1ef   :  { %v724_v40 = vadd.f32 %v723_v37, %v695_v38 }
 0x1f0   :  { %795 = vst [vmem:[#allocation11 + $0x28] sm:$0xff] %v779_v39 }
 0x1f1   :  { %800 = vst [vmem:[#allocation11 + $0x50] sm:$0xff] %v724_v40 }
 0x1f3   :  { %v752_v45 = vpop.f32.mrf.mxu2  ;;  %v781_v46 = vpop.f32.mrf.mxu3 }
 0x1f4   :  { %v753_v33 = vadd.f32 %v752_v45, %v435_v27  ;;  %v697_v34 = vpop.f32.mrf.mxu0  ;;  %v726_v26 = vpop.f32.mrf.mxu1 }
 0x1f5   :  { %v698_v42 = vadd.f32 %v697_v34, %v434_v7 }
 0x1f6   :  { %v782_v49 = vadd.f32 %v781_v46, %v753_v33 }
 0x1f7   :  { %v727_v50 = vadd.f32 %v726_v26, %v698_v42 }
 0x1f8   :  { %801 = vst [vmem:[#allocation11 + $0x58] sm:$0xff] %v782_v49 }
 0x1f9   :  { %806 = vst [vmem:[#allocation11 + $0x80] sm:$0xff] %v727_v50 }
 0x1fb   :  { %v755_v43 = vpop.f32.mrf.mxu2  ;;  %v784_v51 = vpop.f32.mrf.mxu3 }
 0x1fc   :  { %v756_v52 = vadd.f32 %v755_v43, %v435_v27  ;;  %v700_v14 = vpop.f32.mrf.mxu0  ;;  %v729_v54 = vpop.f32.mrf.mxu1 }
 0x1fd   :  { %v701_v15 = vadd.f32 %v700_v14, %v434_v7 }
 0x1fe   :  { %v785_v53 = vadd.f32 %v784_v51, %v756_v52 }
 0x1ff   :  { %v730_v4 = vadd.f32 %v729_v54, %v701_v15 }
 0x200   :  { %807 = vst [vmem:[#allocation11 + $0x88] sm:$0xff] %v785_v53 }
 0x201   :  { %812 = vst [vmem:[#allocation11 + $0xb0] sm:$0xff] %v730_v4 }
 0x203   :  { %v758_v16 = vpop.f32.mrf.mxu2  ;;  %v787_v21 = vpop.f32.mrf.mxu3 }
 0x204   :  { %v759_v55 = vadd.f32 %v758_v16, %v435_v27 }
 0x206   :  { %v788_v56 = vadd.f32 %v787_v21, %v759_v55 }
 0x208   :  { %813 = vst [vmem:[#allocation11 + $0xb8] sm:$0xff] %v788_v56 }
 0x209   :  { %826 = dma.vmem_to_hbm [thread:$0]  %s819_s4, 3072, %s821_s21, [#allocation4], %s1010_s28, %s1010_s28, %s1011_s29  }
 0x20a   :  { %1006 = dma.done.wait [#allocation4], 3072  }
 0x20b   :  { %1007 = vsyncadd [#allocation4], 4294964224 }
 0x20c   :  { %831 = vsyncpa [#allocation3], 1 }
 0x20d   :  { %832 = vsyncpa [#allocation6], 1 }
 0x20e   :  { %833 = vsyncpa [#allocation9], 1 }
 0x20f   :  { %834 = vsyncpa [#allocation4], 1 }

</bundles_post_ra>
